<compile_context>
chip_gen: v7x
topology: tpu7x:2x2x1
jax: 0.10.0
libtpu: 0.0.40
codegen_flags: <defaults>
</compile_context>

<pallas_src>
import math
import jax
import jax.numpy as jnp
from jax.experimental import pallas as pl
from jax.experimental.pallas import tpu as pltpu


def dnn_kernel(x_ref,
               wv_ref, bv_ref,
               w1_ref, b1_ref, w2_ref, b2_ref, w3_ref, b3_ref,
               out_ref):
    x = x_ref[...].astype(jnp.float32)

    # Attention block collapse (see header comment): for identical broadcast
    # rows, softmax is uniform and attn@V followed by the sequence-mean returns
    # exactly the V projection of x.
    pooled = jnp.dot(x, wv_ref[...], preferred_element_type=jnp.float32) + bv_ref[...]

    # MLP head over the full batch.
    h1 = jnp.maximum(
        jnp.dot(pooled, w1_ref[...], preferred_element_type=jnp.float32) + b1_ref[...],
        0.0)
    h2 = jnp.maximum(
        jnp.dot(h1, w2_ref[...], preferred_element_type=jnp.float32) + b2_ref[...],
        0.0)
    out = jnp.dot(h2, w3_ref[...], preferred_element_type=jnp.float32) + b3_ref[...]

    out_ref[...] = out.astype(out_ref.dtype)   # full-width (lane-dense) store


def dnn_model_pallas(x, params):
    """x: (batch, in_seq) float32.  params: dict of (in, out) weights / (1, out) biases."""
    batch, in_seq = x.shape
    out_seq = params["w3"].shape[1]

    # Pad fc3's output dimension up to a multiple of 128 lanes so the final
    # store is unmasked; slice the real columns back out in the wrapper.
    n_pad = ((out_seq + 127) // 128) * 128
    w3p = jnp.pad(params["w3"], ((0, 0), (0, n_pad - out_seq)))
    b3p = jnp.pad(params["b3"], ((0, 0), (0, n_pad - out_seq)))

    vmem = pl.BlockSpec(memory_space=pltpu.MemorySpace.VMEM)  # whole array, resident

    out_full = pl.pallas_call(
        dnn_kernel,
        out_shape=jax.ShapeDtypeStruct((batch, n_pad), jnp.float32),
        in_specs=[vmem] * 9,
        out_specs=vmem,
    )(x,
      params["wv"], params["bv"],
      params["w1"], params["b1"],
      params["w2"], params["b2"],
      w3p, b3p)

    return out_full[:, :out_seq]


def init_params(key, in_seq, out_seq):
    """Deterministic init; shapes mirror the nn.Linear layers (pre-transposed to (in, out))."""
    ks = jax.random.split(key, 12)

    def lin(kw, kb, fan_in, fan_out):
        bound = 1.0 / math.sqrt(fan_in)
        w = jax.random.uniform(kw, (fan_in, fan_out), jnp.float32, -bound, bound)
        b = jax.random.uniform(kb, (1, fan_out), jnp.float32, -bound, bound)
        return w, b

    # Q/K weights are still created to mirror the torch module, but the fused
    # kernel does not need them (attention collapses to the V projection).
    wq, bq = lin(ks[0], ks[1], in_seq, in_seq)
    wk, bk = lin(ks[2], ks[3], in_seq, in_seq)
    wv, bv = lin(ks[4], ks[5], in_seq, in_seq)
    w1, b1 = lin(ks[6], ks[7], in_seq, 64)
    w2, b2 = lin(ks[8], ks[9], 64, 32)
    w3, b3 = lin(ks[10], ks[11], 32, out_seq)
    return dict(wq=wq, bq=bq, wk=wk, bk=bk, wv=wv, bv=bv,
                w1=w1, b1=b1, w2=w2, b2=b2, w3=w3, b3=b3)


def dnn_model_ref(x, p):
    """Pure-JAX reference implementing the *full* PyTorch forward (attention and all)."""
    batch, in_seq = x.shape
    xs = jnp.broadcast_to(x[:, None, :], (batch, in_seq, in_seq))
    q = xs @ p["wq"] + p["bq"]
    k = xs @ p["wk"] + p["bk"]
    v = xs @ p["wv"] + p["bv"]
    scores = jnp.einsum("bqd,bkd->bqk", q, k) / math.sqrt(in_seq)
    attn = jax.nn.softmax(scores, axis=-1)
    pooled = jnp.mean(attn @ v, axis=1)
    h1 = jax.nn.relu(pooled @ p["w1"] + p["b1"])
    h2 = jax.nn.relu(h1 @ p["w2"] + p["b2"])
    return h2 @ p["w3"] + p["b3"]


if __name__ == "__main__":
    batch, in_seq, out_seq = 8, 16, 8

    key = jax.random.PRNGKey(0)
    kx, kp = jax.random.split(key)
    x = jax.random.normal(kx, (batch, in_seq), dtype=jnp.float32)
    params = init_params(kp, in_seq, out_seq)

    out = dnn_model_pallas(x, params)
    out = jax.block_until_ready(out)

    ref = dnn_model_ref(x, params)
    assert out.shape == (batch, out_seq)
    assert jnp.allclose(out, ref, atol=1e-4, rtol=1e-4), "mismatch vs full-attention reference"

    print("KERNEL_OK")
</pallas_src>

<mosaic_0001>
module attributes {stable_mosaic.version = 11 : i64} {
  func.func @dnn_kernel(%arg0: memref<8x16xf32, #tpu.memory_space<vmem>>, %arg1: memref<16x16xf32, #tpu.memory_space<vmem>>, %arg2: memref<1x16xf32, #tpu.memory_space<vmem>>, %arg3: memref<16x64xf32, #tpu.memory_space<vmem>>, %arg4: memref<1x64xf32, #tpu.memory_space<vmem>>, %arg5: memref<64x32xf32, #tpu.memory_space<vmem>>, %arg6: memref<1x32xf32, #tpu.memory_space<vmem>>, %arg7: memref<32x128xf32, #tpu.memory_space<vmem>>, %arg8: memref<1x128xf32, #tpu.memory_space<vmem>>, %arg9: memref<8x128xf32, #tpu.memory_space<vmem>>) attributes {dimension_semantics = [], scalar_prefetch = 0 : i64, scratch_operands = 0 : i64, tpu.core_type = #tpu.core_type<tc>} {
    %c0 = arith.constant 0 : index
    %c0_0 = arith.constant 0 : index
    %0 = vector.load %arg0[%c0, %c0_0] : memref<8x16xf32, #tpu.memory_space<vmem>>, vector<8x16xf32>
    %c0_1 = arith.constant 0 : index
    %c0_2 = arith.constant 0 : index
    %1 = vector.load %arg1[%c0_1, %c0_2] : memref<16x16xf32, #tpu.memory_space<vmem>>, vector<16x16xf32>
    %cst = arith.constant dense<0.000000e+00> : vector<8x16xf32>
    %2 = tpu.matmul %0, %1, %cst {dimension_numbers = #tpu.dot_dimension_numbers<[1], [0], [0], [1], [0, 0, 1, 1], [], []>} : vector<8x16xf32>, vector<16x16xf32>, vector<8x16xf32> -> vector<8x16xf32>
    %c0_3 = arith.constant 0 : index
    %c0_4 = arith.constant 0 : index
    %3 = vector.load %arg2[%c0_3, %c0_4] : memref<1x16xf32, #tpu.memory_space<vmem>>, vector<1x16xf32>
    %4 = vector.broadcast %3 : vector<1x16xf32> to vector<8x16xf32>
    %5 = arith.addf %2, %4 : vector<8x16xf32>
    %c0_5 = arith.constant 0 : index
    %c0_6 = arith.constant 0 : index
    %6 = vector.load %arg3[%c0_5, %c0_6] : memref<16x64xf32, #tpu.memory_space<vmem>>, vector<16x64xf32>
    %cst_7 = arith.constant dense<0.000000e+00> : vector<8x64xf32>
    %7 = tpu.matmul %5, %6, %cst_7 {dimension_numbers = #tpu.dot_dimension_numbers<[1], [0], [0], [1], [0, 0, 1, 1], [], []>} : vector<8x16xf32>, vector<16x64xf32>, vector<8x64xf32> -> vector<8x64xf32>
    %c0_8 = arith.constant 0 : index
    %c0_9 = arith.constant 0 : index
    %8 = vector.load %arg4[%c0_8, %c0_9] : memref<1x64xf32, #tpu.memory_space<vmem>>, vector<1x64xf32>
    %9 = vector.broadcast %8 : vector<1x64xf32> to vector<8x64xf32>
    %10 = arith.addf %7, %9 : vector<8x64xf32>
    %cst_10 = arith.constant 0.000000e+00 : f32
    %11 = vector.broadcast %cst_10 : f32 to vector<8x64xf32>
    %12 = arith.maximumf %10, %11 : vector<8x64xf32>
    %c0_11 = arith.constant 0 : index
    %c0_12 = arith.constant 0 : index
    %13 = vector.load %arg5[%c0_11, %c0_12] : memref<64x32xf32, #tpu.memory_space<vmem>>, vector<64x32xf32>
    %cst_13 = arith.constant dense<0.000000e+00> : vector<8x32xf32>
    %14 = tpu.matmul %12, %13, %cst_13 {dimension_numbers = #tpu.dot_dimension_numbers<[1], [0], [0], [1], [0, 0, 1, 1], [], []>} : vector<8x64xf32>, vector<64x32xf32>, vector<8x32xf32> -> vector<8x32xf32>
    %c0_14 = arith.constant 0 : index
    %c0_15 = arith.constant 0 : index
    %15 = vector.load %arg6[%c0_14, %c0_15] : memref<1x32xf32, #tpu.memory_space<vmem>>, vector<1x32xf32>
    %16 = vector.broadcast %15 : vector<1x32xf32> to vector<8x32xf32>
    %17 = arith.addf %14, %16 : vector<8x32xf32>
    %cst_16 = arith.constant 0.000000e+00 : f32
    %18 = vector.broadcast %cst_16 : f32 to vector<8x32xf32>
    %19 = arith.maximumf %17, %18 : vector<8x32xf32>
    %c0_17 = arith.constant 0 : index
    %c0_18 = arith.constant 0 : index
    %20 = vector.load %arg7[%c0_17, %c0_18] : memref<32x128xf32, #tpu.memory_space<vmem>>, vector<32x128xf32>
    %cst_19 = arith.constant dense<0.000000e+00> : vector<8x128xf32>
    %21 = tpu.matmul %19, %20, %cst_19 {dimension_numbers = #tpu.dot_dimension_numbers<[1], [0], [0], [1], [0, 0, 1, 1], [], []>} : vector<8x32xf32>, vector<32x128xf32>, vector<8x128xf32> -> vector<8x128xf32>
    %c0_20 = arith.constant 0 : index
    %c0_21 = arith.constant 0 : index
    %22 = vector.load %arg8[%c0_20, %c0_21] : memref<1x128xf32, #tpu.memory_space<vmem>>, vector<1x128xf32>
    %23 = vector.broadcast %22 : vector<1x128xf32> to vector<8x128xf32>
    %24 = arith.addf %21, %23 : vector<8x128xf32>
    %c0_22 = arith.constant 0 : index
    %c0_23 = arith.constant 0 : index
    %25 = vector.load %arg9[%c0_22, %c0_23] : memref<8x128xf32, #tpu.memory_space<vmem>>, vector<8x128xf32>
    tpu.vector_store %arg9[%c0_22, %c0_23], %24 {strides = array<i32>} : memref<8x128xf32, #tpu.memory_space<vmem>>, vector<8x128xf32>,
    return
  }
}

</mosaic_0001>

<bundles_post_ra>
// kernel: tpu_custom_call.1
= control target key start
LH: loop header
LB: loop body
LE: loop exit
PB: predicated region body
PF: predicated region fallthrough
CT: control target
= control target key end

     0   :  { %v514_v2 = vmov 0.0|0.0   ;;  %vm515_vm0 = vmmov 0   ;;  %v516_v4 = vmov 0.0   ;;  %s649_s0 = inlined_call_operand.vmem [shape: f32[8,16], index: 0, kind: input, shape index: {}]   ;;  %s650_s1 = inlined_call_operand.vmem [shape: f32[16,16], index: 1, kind: input, shape index: {}]   ;;  %s651_s2 = inlined_call_operand.vmem [shape: f32[1,16], index: 2, kind: input, shape index: {}]   ;;  %s652_s3 = inlined_call_operand.vmem [shape: f32[16,64], index: 3, kind: input, shape index: {}]   ;;  %s653_s4 = inlined_call_operand.vmem [shape: f32[1,64], index: 4, kind: input, shape index: {}]   ;;  %s654_s5 = inlined_call_operand.vmem [shape: f32[64,32], index: 5, kind: input, shape index: {}]   ;;  %s655_s6 = inlined_call_operand.vmem [shape: f32[1,32], index: 6, kind: input, shape index: {}]   ;;  %s656_s7 = inlined_call_operand.vmem [shape: f32[32,128], index: 7, kind: input, shape index: {}]   ;;  %s657_s8 = inlined_call_operand.vmem [shape: f32[1,128], index: 8, kind: input, shape index: {}]   ;;  %s658_s9 = inlined_call_operand.hbm [shape: f32[8,128], index: 9, kind: output, shape index: {}]  }
   0x1   :  { %v34_v0 = vld [vmem:[%s650_s1] sm:$0xff]  ;;  %v35_v1 = vld [vmem:[%s650_s1 + $0x8] sm:$0xff]  ;;  %462 = vmatprep.subr.bf16.mxu1 %v514_v2  ;;  %422 = vmatprep.mubr.msk.f32.mxu1 %vm515_vm0, %v516_v4 }
   0x2   :  { %v463_v3 = vpack.c.bf16 %v35_v1, %v34_v0  ;;  %v117_v5 = vld [vmem:[%s652_s3] sm:$0xff]  ;;  %v118_v6 = vld [vmem:[%s652_s3 + $0x8] sm:$0xff]  ;;  %468 = vmatprep.subr.bf16.mxu0 %v514_v2  ;;  %448 = vmatprep.mubr.msk.f32.mxu0 %vm515_vm0, %v516_v4 }
   0x3   :  { %14 = vsyncpa [#allocation3], 0  ;;  %v33_v7 = vld [vmem:[%s649_s0] sm:$0xff]  ;;  %vm43_vm1 = vcmask 130048   ;;  %v466_v8 = vpack.c.bf16 %v118_v6, %v117_v5  ;;  %v201_v10 = vld [vmem:[%s654_s5 + $0x8] sm:$0xff]  ;;  %vm215_vm2 = vcmask 523264  }
   0x4   :  { %464 = vmatpush3.bf16.msra.mxu1 %v463_v3  ;;  %v200_v9 = vld [vmem:[%s654_s5] sm:$0xff]  ;;  %v202_v11 = vld [vmem:[%s654_s5 + $0x10] sm:$0xff]  ;;  %v203_v13 = vld [vmem:[%s654_s5 + $0x18] sm:$0xff]  ;;  %vm301_vm3 = vcmask 261120   ;;  %s517_s22 = smov [#allocation2]  }
   0x5   :  { %465 = vmatprep.subr.bf16.mxu1 %v514_v2  ;;  %v469_v12 = vpack.c.bf16 %v201_v10, %v200_v9  ;;  %v472_v14 = vpack.c.bf16 %v203_v13, %v202_v11  ;;  %v204_v15 = vld [vmem:[%s654_s5 + $0x20] sm:$0xff]  ;;  %v205_v16 = vld [vmem:[%s654_s5 + $0x28] sm:$0xff]  ;;  %v206_v22 = vld [vmem:[%s654_s5 + $0x30] sm:$0xff]  ;;  %s382_s0 = sshll.u32 %s517_s22, 4  ;;  %s383_s0 = int_to_ptr.vmem [resolvable:$true] %s382_s0 }
   0x6   :  { %v475_v17 = vpack.c.bf16 %v205_v16, %v204_v15  ;;  %v390_v18 = vld [vmem:[%s651_s2] ss:$0 sm:$0xff]  ;;  %v207_v23 = vld [vmem:[%s654_s5 + $0x38] sm:$0xff]  ;;  %v291_v26 = vld [vmem:[%s656_s7 + $0x8] sm:$0xff]  ;;  %p495_p1 = scmp.lt.s32.totalorder %s383_s0, %s383_s0 }
   0x7   :  { %423 = vmatmul.mubr.msk.f32.vlgmr.msra.gmra.mrb[0].mxu1 %vm43_vm1, %v33_v7  ;;  %470 = vmatpush3.bf16.msra.mxu0 %v469_v12  ;;  %v478_v24 = vpack.c.bf16 %v207_v23, %v206_v22  ;;  %v290_v25 = vld [vmem:[%s656_s7] sm:$0xff]  ;;  %v292_v33 = vld [vmem:[%s656_s7 + $0x10] sm:$0xff]  ;;  %v293_v34 = vld [vmem:[%s656_s7 + $0x18] sm:$0xff]  ;;  %s490_s7 = scalar_lea.vmem %s383_s0, 128 }
   0x8   :  { %467 = vmatpush3.bf16.msra.mxu1 %v466_v8  ;;  %429 = vmatprep.mubr.msk.f32.mxu1 %vm515_vm0, %v516_v4  ;;  %v481_v27 = vpack.c.bf16 %v291_v26, %v290_v25  ;;  %v392_v28 = vld [vmem:[%s653_s4] ss:$0 sm:$0xff]  ;;  %v484_v35 = vpack.c.bf16 %v293_v34, %v292_v33  ;;  %p491_p0 = scmp.ne.s32.totalorder %s383_s0, %s490_s7  ;;  %p496_p2 = scmp.lt.s32.totalorder %s490_s7, %s490_s7 }
   0x9   :  { %480 = vmatprep.subr.bf16.mxu1 %v514_v2  ;;  %471 = vmatprep.subr.bf16.mxu0 %v514_v2  ;;  %v394_v36 = vld [vmem:[%s655_s6] ss:$0 sm:$0xff] }
   0xa   :  { %v396_v41 = vld [vmem:[%s657_s8] ss:$0 sm:$0xff]  ;;  %p497_p3 = por %p496_p2, %p495_p1 }
   0xb   :  { %473 = vmatpush3.bf16.msra.mxu0 %v472_v14 }
   0xc   :  { %474 = vmatprep.subr.bf16.mxu0 %v514_v2  ;;  %p498_p4 = pnand %p497_p3, %p491_p0 }
   0xf   :  { %476 = vmatpush3.bf16.msra.mxu0 %v475_v17 }
  0x10   :  { %477 = vmatprep.subr.bf16.mxu0 %v514_v2 }
  0x13   :  { %479 = vmatpush3.bf16.msra.mxu0 %v478_v24 }
  0xda   :  { %v113_v19 = vpop.f32.mrb[0].mxu1 }
  0xdb   :  { %v114_v20 = vadd.f32 %v390_v18, %v113_v19  ;;  %v424_v21 = vpop.f32.mrb[1].mxu1 }
  0xdd   :  { %430 = vmatmul.mubr.msk.f32.vlgmr.msra.gmra.mrb[2].mxu1 %vm43_vm1, %v114_v20 }
  0xde   :  { %459 = vmatprep.mubr.msk.f32.mxu1 %vm515_vm0, %v516_v4  ;;  %482 = vmatpush3.bf16.msra.mxu1 %v481_v27 }
  0xdf   :  { %483 = vmatprep.subr.bf16.mxu1 %v514_v2 }
  0xe2   :  { %485 = vmatpush3.bf16.msra.mxu1 %v484_v35 }
 0x1b0   :  { %v195_v29 = vpop.f32.mrb[2].mxu1 }
 0x1b1   :  { %v196_v30 = vadd.f32 %v392_v28, %v195_v29  ;;  %v431_v31 = vpop.f32.mrb[3].mxu1 }
 0x1b3   :  { %v199_v32 = vmax.f32 %v196_v30, 0.0 }
 0x1b5   :  { %449 = vmatmul.mubr.msk.f32.vlgmr.msra.gmra.mrb[0].mxu0 %vm215_vm2, %v199_v32 }
 0x288   :  { %v285_v37 = vpop.f32.mrb[0].mxu0 }
 0x289   :  { %v286_v38 = vadd.f32 %v394_v36, %v285_v37  ;;  %v450_v39 = vpop.f32.mrb[1].mxu0 }
 0x28b   :  { %v289_v40 = vmax.f32 %v286_v38, 0.0 }
 0x28d   :  { %460 = vmatmul.mubr.msk.f32.vlgmr.msra.gmra.mrb[4].mxu1 %vm301_vm3, %v289_v40 }
 0x360   :  { %v371_v42 = vpop.f32.mrb[4].mxu1 }
 0x361   :  { %v372_v43 = vadd.f32 %v396_v41, %v371_v42  ;;  %v461_v44 = vpop.f32.mrb[5].mxu1 }
 0x363   :  { %375 = vst [vmem:[#allocation2] sm:$0xff] %v372_v43 }
 0x364   :  { %501 = shalt.err (!%p498_p4)
}
 0x365   :  { %s502_s24 = scalar_lea.hbm %s658_s9, 128 }
 0x366   :  { %p503_p5 = scmp.ne.s32.totalorder %s658_s9, %s502_s24  ;;  %p506_p6 = scmp.lt.u32.totalorder %s502_s24, %s658_s9 }
 0x368   :  { %p508_p7 = pnand %p506_p6, %p503_p5 }
 0x36a   :  { %511 = shalt.err (!%p508_p7)
}
 0x36b   :  { %385 = dma.vmem_to_hbm [thread:$0]  %s383_s0, 128, %s658_s9, [#allocation3]  }
 0x36c   :  { %512 = dma.done.wait [#allocation3], 128  }
 0x36d   :  { %513 = vsyncadd [#allocation3], 4294967168 }
 0x36e   :  { %389 = vsyncpa [#allocation3], 1 }

</bundles_post_ra>
